<compile_context>
chip_gen: v6e
topology: v6e:2x2x1
jax: 0.10.0
libtpu: 0.0.40
codegen_flags: <defaults>
</compile_context>

<pallas_src>
import functools

import jax
import jax.numpy as jnp
from jax.experimental import pallas as pl
from jax.experimental.pallas import tpu as pltpu


LANES = 128
SUBLANES = 8
MAX_BLOCK_ROWS = 1024     # 1024x128 f32 = 512 KiB / input buffer -> fits all gens
NUM_SPLITS = 2            # leading "parallel" axis (uses both TCs on v7x megacore)


def _masked_mse_kernel(x_ref, t_ref, m_ref, num_out, den_out, *,
                       block_rows, tiles_per_split, rows_valid):
    # x_ref/t_ref/m_ref: (block_rows, 128) tiles (native dtype) in VMEM
    # num_out/den_out:   (1, 8, 128) f32 per-split partial accumulators
    #                    (resident across the "arbitrary" axis j)
    i = pl.program_id(0)          # parallel split
    j = pl.program_id(1)          # streaming / reduction axis

    @pl.when(j == 0)
    def _():
        num_out[...] = jnp.zeros_like(num_out)
        den_out[...] = jnp.zeros_like(den_out)

    # Validity mask built from the *unclamped* global tile index: it zeroes
    # out the ragged tail of the last tile and any over-split tiles, using a
    # select (not a multiply) so garbage in partially-read blocks is inert.
    tile = i * tiles_per_split + j
    row0 = tile * block_rows
    row_ids = row0 + jax.lax.broadcasted_iota(jnp.int32, (block_rows, LANES), 0)
    valid = row_ids < rows_valid

    x = x_ref[...].astype(jnp.float32)
    t = t_ref[...].astype(jnp.float32)
    m = m_ref[...].astype(jnp.float32)

    d = x - t
    diff2 = jnp.where(valid, d * d * m, 0.0)
    m_v = jnp.where(valid, m, 0.0)

    # Fold rows down to one vreg-shaped (8,128) partial per quantity:
    # pure VPU adds that hide under the input DMA; no cross-lane reduce
    # and no serial scalar read-modify-write chain in the hot loop.
    folded = (1, block_rows // SUBLANES, SUBLANES, LANES)
    num_out[...] += diff2.reshape(folded).sum(axis=1)
    den_out[...] += m_v.reshape(folded).sum(axis=1)


def masked_mse_loss(inp, target, mask):
    """Computes sum((inp - target)**2 * mask) / sum(mask) with a Pallas kernel."""
    x = jnp.ravel(inp)
    t = jnp.ravel(target)
    m = jnp.ravel(mask)

    # Stream floating dtypes at their native width (cast to f32 in-kernel);
    # only bool/int masks are promoted so they travel on the vector path.
    if not jnp.issubdtype(x.dtype, jnp.floating):
        x = x.astype(jnp.float32)
    if not jnp.issubdtype(t.dtype, jnp.floating):
        t = t.astype(jnp.float32)
    if not jnp.issubdtype(m.dtype, jnp.floating):
        m = m.astype(jnp.float32)

    n = x.shape[0]
    # Minimal padding: only to an (8*128)-element granularity so the stream can
    # be viewed as [rows, 128] with rows % 8 == 0.  Skipped when already even.
    chunk = SUBLANES * LANES
    n_pad = ((n + chunk - 1) // chunk) * chunk
    pad = n_pad - n
    if pad:
        # mask pads with zeros -> padded elements contribute nothing
        x = jnp.pad(x, (0, pad))
        t = jnp.pad(t, (0, pad))
        m = jnp.pad(m, (0, pad))

    rows = n_pad // LANES
    x2 = x.reshape(rows, LANES)
    t2 = t.reshape(rows, LANES)
    m2 = m.reshape(rows, LANES)

    # Big row tiles: if the whole stream fits in one block, use it (block ==
    # full dims is always a legal layout); otherwise 1024 rows (multiple of 32,
    # legal for f32/bf16/int8 alike) with an in-kernel-masked partial tail.
    block_rows = min(MAX_BLOCK_ROWS, rows)
    tiles_total = pl.cdiv(rows, block_rows)
    tiles_per_split = pl.cdiv(tiles_total, NUM_SPLITS)

    def in_map(i, j):
        # Clamp so over-split blocks never index past the array; their
        # contribution is zeroed in-kernel via the validity mask.
        return (jnp.minimum(i * tiles_per_split + j, tiles_total - 1), 0)

    def out_map(i, j):
        return (i, 0, 0)

    kernel = functools.partial(
        _masked_mse_kernel,
        block_rows=block_rows,
        tiles_per_split=tiles_per_split,
        rows_valid=rows,
    )

    tile_spec = pl.BlockSpec((block_rows, LANES), in_map)
    part_spec = pl.BlockSpec((1, SUBLANES, LANES), out_map)
    part_shape = jax.ShapeDtypeStruct((NUM_SPLITS, SUBLANES, LANES), jnp.float32)

    num_parts, den_parts = pl.pallas_call(
        kernel,
        out_shape=(part_shape, part_shape),
        grid_spec=pltpu.PrefetchScalarGridSpec(
            num_scalar_prefetch=0,
            grid=(NUM_SPLITS, tiles_per_split),
            in_specs=[tile_spec, tile_spec, tile_spec],
            out_specs=[part_spec, part_spec],
        ),
        compiler_params=pltpu.CompilerParams(
            dimension_semantics=("parallel", "arbitrary"),
        ),
    )(x2, t2, m2)

    # Tiny final combine (2*8*128 elements each) + divide in plain XLA.
    num = jnp.sum(num_parts)
    den = jnp.sum(den_parts)
    # Note: division by sum(mask)==0 yields nan/inf, matching PyTorch.
    return num / den


if __name__ == "__main__":
    key = jax.random.PRNGKey(0)
    k1, k2, k3 = jax.random.split(key, 3)

    def _ref(inp, target, mask):
        return jnp.sum((inp.ravel() - target.ravel()) ** 2 * mask.ravel()) / jnp.sum(mask)

    # Primary small NCHW-shaped example (module is shape-agnostic; it flattens).
    shape = (2, 4, 16, 16)
    inp = jax.random.normal(k1, shape, dtype=jnp.float32)
    target = jax.random.normal(k2, shape, dtype=jnp.float32)
    mask = (jax.random.uniform(k3, shape) > 0.5).astype(jnp.float32)

    result = masked_mse_loss(inp, target, mask)
    jax.block_until_ready(result)
    ref = _ref(inp, target, mask)
    assert jnp.allclose(result, ref, rtol=1e-5, atol=1e-6), (result, ref)

    # Ragged size (exercises the small-granularity pad path).
    shape2 = (3, 5, 7, 11)   # 1155 elements, not a multiple of 8*128
    inp2 = jax.random.normal(k1, shape2, dtype=jnp.float32)
    target2 = jax.random.normal(k2, shape2, dtype=jnp.float32)
    mask2 = (jax.random.uniform(k3, shape2) > 0.5).astype(jnp.float32)
    r2 = masked_mse_loss(inp2, target2, mask2)
    jax.block_until_ready(r2)
    assert jnp.allclose(r2, _ref(inp2, target2, mask2), rtol=1e-5, atol=1e-6)

    # Multi-tile case (exercises the 2-way split + masked partial last block).
    shape3 = (1500, 128)
    inp3 = jax.random.normal(k1, shape3, dtype=jnp.float32)
    target3 = jax.random.normal(k2, shape3, dtype=jnp.float32)
    mask3 = (jax.random.uniform(k3, shape3) > 0.5).astype(jnp.float32)
    r3 = masked_mse_loss(inp3, target3, mask3)
    jax.block_until_ready(r3)
    assert jnp.allclose(r3, _ref(inp3, target3, mask3), rtol=1e-5, atol=1e-6)

    print("KERNEL_OK")
</pallas_src>

<mosaic_0001>
module attributes {stable_mosaic.version = 11 : i64} {
  func.func @_masked_mse_kernel(%arg0: i32, %arg1: i32, %arg2: memref<16x128xf32, #tpu.memory_space<vmem>>, %arg3: memref<16x128xf32, #tpu.memory_space<vmem>>, %arg4: memref<16x128xf32, #tpu.memory_space<vmem>>, %arg5: memref<1x8x128xf32, #tpu.memory_space<vmem>>, %arg6: memref<1x8x128xf32, #tpu.memory_space<vmem>>) attributes {dimension_semantics = [#tpu.dimension_semantics<parallel>, #tpu.dimension_semantics<arbitrary>], iteration_bounds = array<i64: 2, 1>, scalar_prefetch = 0 : i64, scratch_operands = 0 : i64, tpu.core_type = #tpu.core_type<tc>, window_params = [{transform_indices = @transform_0, window_bounds = array<i64: 16, 128>}, {transform_indices = @transform_1, window_bounds = array<i64: 16, 128>}, {transform_indices = @transform_2, window_bounds = array<i64: 16, 128>}, {transform_indices = @transform_3, window_bounds = array<i64: 1, 8, 128>}, {transform_indices = @transform_4, window_bounds = array<i64: 1, 8, 128>}]} {
    %c0_i32 = arith.constant 0 : i32
    %0 = arith.cmpi eq, %arg1, %c0_i32 : i32
    %1 = arith.extui %0 : i1 to i32
    %c0_i32_0 = arith.constant 0 : i32
    %2 = arith.cmpi ne, %1, %c0_i32_0 : i32
    scf.if %2 {
      %cst_22 = arith.constant 0.000000e+00 : f32
      %31 = vector.broadcast %cst_22 : f32 to vector<1x8x128xf32>
      %c0_23 = arith.constant 0 : index
      %c0_24 = arith.constant 0 : index
      %c0_25 = arith.constant 0 : index
      %32 = vector.load %arg5[%c0_23, %c0_24, %c0_25] : memref<1x8x128xf32, #tpu.memory_space<vmem>>, vector<1x8x128xf32>
      tpu.vector_store %arg5[%c0_23, %c0_24, %c0_25], %31 {strides = array<i32>} : memref<1x8x128xf32, #tpu.memory_space<vmem>>, vector<1x8x128xf32>,
      %cst_26 = arith.constant 0.000000e+00 : f32
      %33 = vector.broadcast %cst_26 : f32 to vector<1x8x128xf32>
      %c0_27 = arith.constant 0 : index
      %c0_28 = arith.constant 0 : index
      %c0_29 = arith.constant 0 : index
      %34 = vector.load %arg6[%c0_27, %c0_28, %c0_29] : memref<1x8x128xf32, #tpu.memory_space<vmem>>, vector<1x8x128xf32>
      tpu.vector_store %arg6[%c0_27, %c0_28, %c0_29], %33 {strides = array<i32>} : memref<1x8x128xf32, #tpu.memory_space<vmem>>, vector<1x8x128xf32>,
    } else {
    }
    %c1_i32 = arith.constant 1 : i32
    %3 = arith.muli %arg0, %c1_i32 : i32
    %4 = arith.addi %3, %arg1 : i32
    %c16_i32 = arith.constant 16 : i32
    %5 = arith.muli %4, %c16_i32 : i32
    %6 = tpu.iota {dimensions = array<i32: 0>} : vector<16x128xi32>
    %7 = vector.broadcast %5 : i32 to vector<16x128xi32>
    %8 = arith.addi %7, %6 : vector<16x128xi32>
    %c16_i32_1 = arith.constant 16 : i32
    %9 = vector.broadcast %c16_i32_1 : i32 to vector<16x128xi32>
    %10 = arith.cmpi slt, %8, %9 : vector<16x128xi32>
    %c0 = arith.constant 0 : index
    %c0_2 = arith.constant 0 : index
    %11 = vector.load %arg2[%c0, %c0_2] : memref<16x128xf32, #tpu.memory_space<vmem>>, vector<16x128xf32>
    %c0_3 = arith.constant 0 : index
    %c0_4 = arith.constant 0 : index
    %12 = vector.load %arg3[%c0_3, %c0_4] : memref<16x128xf32, #tpu.memory_space<vmem>>, vector<16x128xf32>
    %c0_5 = arith.constant 0 : index
    %c0_6 = arith.constant 0 : index
    %13 = vector.load %arg4[%c0_5, %c0_6] : memref<16x128xf32, #tpu.memory_space<vmem>>, vector<16x128xf32>
    %14 = arith.subf %11, %12 : vector<16x128xf32>
    %15 = arith.mulf %14, %14 : vector<16x128xf32>
    %16 = arith.mulf %15, %13 : vector<16x128xf32>
    %cst = arith.constant 0.000000e+00 : f32
    %17 = vector.broadcast %cst : f32 to vector<16x128xf32>
    %18 = arith.select %10, %16, %17 : vector<16x128xi1>, vector<16x128xf32>
    %cst_7 = arith.constant 0.000000e+00 : f32
    %19 = vector.broadcast %cst_7 : f32 to vector<16x128xf32>
    %20 = arith.select %10, %13, %19 : vector<16x128xi1>, vector<16x128xf32>
    %c0_8 = arith.constant 0 : index
    %c0_9 = arith.constant 0 : index
    %c0_10 = arith.constant 0 : index
    %21 = vector.load %arg5[%c0_8, %c0_9, %c0_10] : memref<1x8x128xf32, #tpu.memory_space<vmem>>, vector<1x8x128xf32>
    %22 = vector.shape_cast %18 : vector<16x128xf32> to vector<1x2x8x128xf32>
    %cst_11 = arith.constant dense<0.000000e+00> : vector<1x8x128xf32>
    %23 = vector.multi_reduction <add>, %22, %cst_11 [1] : vector<1x2x8x128xf32> to vector<1x8x128xf32>
    %24 = arith.addf %21, %23 : vector<1x8x128xf32>
    %c0_12 = arith.constant 0 : index
    %c0_13 = arith.constant 0 : index
    %c0_14 = arith.constant 0 : index
    %25 = vector.load %arg5[%c0_12, %c0_13, %c0_14] : memref<1x8x128xf32, #tpu.memory_space<vmem>>, vector<1x8x128xf32>
    tpu.vector_store %arg5[%c0_12, %c0_13, %c0_14], %24 {strides = array<i32>} : memref<1x8x128xf32, #tpu.memory_space<vmem>>, vector<1x8x128xf32>,
    %c0_15 = arith.constant 0 : index
    %c0_16 = arith.constant 0 : index
    %c0_17 = arith.constant 0 : index
    %26 = vector.load %arg6[%c0_15, %c0_16, %c0_17] : memref<1x8x128xf32, #tpu.memory_space<vmem>>, vector<1x8x128xf32>
    %27 = vector.shape_cast %20 : vector<16x128xf32> to vector<1x2x8x128xf32>
    %cst_18 = arith.constant dense<0.000000e+00> : vector<1x8x128xf32>
    %28 = vector.multi_reduction <add>, %27, %cst_18 [1] : vector<1x2x8x128xf32> to vector<1x8x128xf32>
    %29 = arith.addf %26, %28 : vector<1x8x128xf32>
    %c0_19 = arith.constant 0 : index
    %c0_20 = arith.constant 0 : index
    %c0_21 = arith.constant 0 : index
    %30 = vector.load %arg6[%c0_19, %c0_20, %c0_21] : memref<1x8x128xf32, #tpu.memory_space<vmem>>, vector<1x8x128xf32>
    tpu.vector_store %arg6[%c0_19, %c0_20, %c0_21], %29 {strides = array<i32>} : memref<1x8x128xf32, #tpu.memory_space<vmem>>, vector<1x8x128xf32>,
    return
  }
  func.func @transform_0(%arg0: i32, %arg1: i32) -> (i32, i32) {
    %c1_i32 = arith.constant 1 : i32
    %0 = arith.muli %arg0, %c1_i32 : i32
    %1 = arith.addi %0, %arg1 : i32
    %c0_i32 = arith.constant 0 : i32
    %2 = arith.minsi %1, %c0_i32 : i32
    %c0_i32_0 = arith.constant 0 : i32
    %c0_i32_1 = arith.constant 0 : i32
    return %2, %c0_i32_0 : i32, i32
  }
  func.func @transform_1(%arg0: i32, %arg1: i32) -> (i32, i32) {
    %c1_i32 = arith.constant 1 : i32
    %0 = arith.muli %arg0, %c1_i32 : i32
    %1 = arith.addi %0, %arg1 : i32
    %c0_i32 = arith.constant 0 : i32
    %2 = arith.minsi %1, %c0_i32 : i32
    %c0_i32_0 = arith.constant 0 : i32
    %c0_i32_1 = arith.constant 0 : i32
    return %2, %c0_i32_0 : i32, i32
  }
  func.func @transform_2(%arg0: i32, %arg1: i32) -> (i32, i32) {
    %c1_i32 = arith.constant 1 : i32
    %0 = arith.muli %arg0, %c1_i32 : i32
    %1 = arith.addi %0, %arg1 : i32
    %c0_i32 = arith.constant 0 : i32
    %2 = arith.minsi %1, %c0_i32 : i32
    %c0_i32_0 = arith.constant 0 : i32
    %c0_i32_1 = arith.constant 0 : i32
    return %2, %c0_i32_0 : i32, i32
  }
  func.func @transform_3(%arg0: i32, %arg1: i32) -> (i32, i32, i32) {
    %c0_i32 = arith.constant 0 : i32
    %c0_i32_0 = arith.constant 0 : i32
    %c0_i32_1 = arith.constant 0 : i32
    return %arg0, %c0_i32, %c0_i32_0 : i32, i32, i32
  }
  func.func @transform_4(%arg0: i32, %arg1: i32) -> (i32, i32, i32) {
    %c0_i32 = arith.constant 0 : i32
    %c0_i32_0 = arith.constant 0 : i32
    %c0_i32_1 = arith.constant 0 : i32
    return %arg0, %c0_i32, %c0_i32_0 : i32, i32, i32
  }
}

</mosaic_0001>

<bundles_post_ra>
// kernel: tpu_custom_call.1
= control target key start
LH: loop header
LB: loop body
LE: loop exit
PB: predicated region body
PF: predicated region fallthrough
CT: control target
= control target key end

     0   :  { %10 = vsyncpa [#allocation3], 0  ;;  %s1227_s0 = inlined_call_operand.hbm [shape: f32[16,128], index: 0, kind: input, shape index: {}]   ;;  %s1228_s1 = inlined_call_operand.hbm [shape: f32[16,128], index: 1, kind: input, shape index: {}]   ;;  %s1229_s2 = inlined_call_operand.hbm [shape: f32[16,128], index: 2, kind: input, shape index: {}]   ;;  %s1230_s3 = inlined_call_operand.hbm [shape: f32[2,8,128], index: 3, kind: output, shape index: {0}]   ;;  %s1231_s4 = inlined_call_operand.hbm [shape: f32[2,8,128], index: 4, kind: output, shape index: {1}]  }
   0x1   :  { %12 = vsyncpa [#allocation3 + $0x1], 0 }
   0x2   :  { %13 = vsyncpa [#allocation6], 0 }
   0x3   :  { %15 = vsyncpa [#allocation6 + $0x1], 0 }
   0x4   :  { %16 = vsyncpa [#allocation4], 0 }
   0x5   :  { %18 = vsyncpa [#allocation4 + $0x1], 0 }
   0x6   :  { %19 = vsyncpa [#allocation10], 0 }
   0x7   :  { %21 = vsyncpa [#allocation10 + $0x1], 0  ;;  %s966_s15 = smov 0   ;;  %s968_s16 = smov 0  }
   0x8   :  { %s970_s17 = smov 0   ;;  %s972_s18 = smov 0  }
   0x9   :  { %s974_s19 = smov 0   ;;  %s976_s20 = smov 0  }
   0xa   :  { %s978_s21 = smov 0   ;;  %s980_s22 = smov 0  }
   0xb LB: > { %1236 = sst [smem:[#allocation15_spill]] %s928_s21  ;;  %s1005_s23 = sadd.s32 4294967295, %s932_s22   ;;  %s932_s22 = sphi %s980_s22, %s27_s22   ;;  %s928_s21 = sphi %s978_s21, %s1254_s21   ;;  %s924_s20 = sphi %s976_s20, %s1253_s20   ;;  %s920_s19 = sphi %s974_s19, %s1217_s19   ;;  %s916_s18 = sphi %s972_s18, %s1258_s18   ;;  %s912_s17 = sphi %s970_s17, %s1257_s17   ;;  %s908_s16 = sphi %s968_s16, %s1256_s16   ;;  %s904_s15 = sphi %s966_s15, %s1255_s15  }
   0xc   : > { %s581_s24 = sadd.s32 4294967294, %s932_s22   ;;  %s39_s25 = sadd.s32 1, %s928_s21 }
   0xd   : > { %p41_p0 = scmp.ge.s32.totalorder %s39_s25, 2  ;;  %p901_p1 = scmp.ne.s32.totalorder %s920_s19, 0 }
   0xe   : > { %p60_p2 = scmp.eq.s32.totalorder %s932_s22, 0  ;;  %p65_p3 = scmp.ne.s32.totalorder %s920_s19, %s916_s18 }
   0xf   : > { %s1260_s25 = smov (%p41_p0, %s39_s25), 0  ;;  %p66_p5 = scmp.eq.s32.totalorder %s1005_s23, 0 }
  0x10   : > { %1237 = sst [smem:[#allocation16_spill]] %s1260_s25  ;;  %p1014_p4 = por %p901_p1, %p60_p2 }
  0x11   : > { %p1019_p6 = por %p66_p5, %p65_p3  ;;  %s139_s28 = ssub.s32 %s928_s21, %s1260_s25 }
  0x12   : > { %p140_p7 = scmp.eq.s32.totalorder %s139_s28, 0  ;;  %s142_s29 = sadd.s32 1, %s912_s17 }
  0x13   : > { %s1239_s27 = scalar_select %p1019_p6, 1, 0 }
  0x14   : > { %s1027_s30 = scalar_select %p140_p7, %s912_s17, %s142_s29  }
  0x15   : > { %p152_p8 = scmp.ne.s32.totalorder %s912_s17, %s908_s16  ;;  %p153_p9 = scmp.eq.s32.totalorder %s1005_s23, 1 }
  0x16   : > { %1240 = sst [smem:[#allocation17_spill]] %s1027_s30  ;;  %p158_p10 = scmp.ne.s32.totalorder %s908_s16, %s904_s15 }
  0x17   : > { %p159_p11 = scmp.eq.s32.totalorder %s581_s24, 1  ;;  %p1034_p12 = por %p153_p9, %p152_p8 }
  0x18   : > { %p636_p1 = scmp.lt.s32.totalorder %s932_s22, 2  ;;  %s229_s8 = sand.u32 1, %s932_s22  }
  0x19   : > { %s1241_s5 = scalar_select %p1034_p12, 1, 0 }
  0x1a   : > { %p1039_p0 = por %p159_p11, %p158_p10  ;;  %p1046_p2 = pnand %p636_p1, %p1014_p4 }
  0x1b   : > { %s934_s9 = smov [#allocation5]   ;;  %s1052_s11 = scalar_lea.sflag [#allocation6], %s229_s8 }
  0x1c   : > { %s1242_s6 = scalar_select %p1039_p0, 1, 0 }
  0x1d   : > { %s243_s10 = sshll.u32 %s934_s9, 4  ;;  %s713_s14 = scalar_lea.hbm %s1228_s1, 256  ;;  %s244_s10 = int_to_ptr.vmem [resolvable:$true] %s243_s10 }
  0x1e   : > { %p714_p5 = scmp.ne.s32.totalorder %s1228_s1, %s713_s14  ;;  %p1062_p4 = pneg %p1046_p2 }
  0x1f   : > { %p720_p9 = scmp.lt.s32.totalorder %s713_s14, %s713_s14 }
  0x20   : > { %p716_p7 = pnand %p1062_p4, %p714_p5 }
  0x22   : > { %p717_p8 = pneg %p716_p7 }
  0x24   : > { %p722_p10 = pnand %p720_p9, %p717_p8 }
  0x26   : > { %725 = shalt.err (!%p722_p10)
}
  0x27   : > { %s726_s28 = scalar_lea.vmem %s244_s10, 256  ;;  %s733_s29 = scalar_lea.vmem %s244_s10, 512 }
  0x28   : > { %p727_p11 = scmp.ne.s32.totalorder %s244_s10, %s726_s28  ;;  %p734_p3 = scmp.lt.s32.totalorder %s244_s10, %s244_s10 }
  0x29   : > { %p735_p0 = scmp.lt.s32.totalorder %s733_s29, %s726_s28 }
  0x2a   : > { %p729_p1 = pnand %p727_p11, %p1062_p4 }
  0x2b   : > { %p736_p12 = por %p735_p0, %p734_p3 }
  0x2c   : > { %p730_p13 = pneg %p729_p1 }
  0x2e   : > { %p737_p6 = pnand %p736_p12, %p730_p13 }
  0x30   : > { %740 = shalt.err (!%p737_p6)
}
  0x31   : > { %s935_s8 = smov 128   ;;  %s936_s9 = smov 8  }
  0x32   : > { %625 = dma.hbm_to_vmem [thread:$0]  (!%p1046_p2), %s1228_s1, 256, %s244_s10, %s1052_s11, %s935_s8, %s935_s8, %s936_s9  }
  0x33   : > { %p275_p5 = scmp.lt.s32.totalorder %s932_s22, 3  ;;  %p1245_p7 = scmp.ge.s32.totalorder %s932_s22, 1 }
  0x34   : > { %s937_s18 = smov [#allocation2]   ;;  %s741_s25 = scalar_lea.hbm %s1227_s0, 256 }
  0x35   : > { %p1082_p0 = pnand %p1245_p7, %p275_p5  ;;  %s219_s24 = sshll.u32 %s937_s18, 4  ;;  %s220_s24 = int_to_ptr.vmem [resolvable:$true] %s219_s24 }
  0x36   : > { %p742_p6 = scmp.ne.s32.totalorder %s1227_s0, %s741_s25  ;;  %p748_p3 = scmp.lt.s32.totalorder %s741_s25, %s741_s25 }
  0x37   : > { %s1246_s14 = scalar_select %p1082_p0, 1, 0 }
  0x38   : > { %p744_p12 = pnand %p742_p6, %p1062_p4 }
  0x3a   : > { %p745_p13 = pneg %p744_p12 }
  0x3c   : > { %p750_p8 = pnand %p748_p3, %p745_p13 }
  0x3e   : > { %753 = shalt.err (!%p750_p8)
}
  0x3f   : > { %s754_s10 = scalar_lea.vmem %s220_s24, 256  ;;  %s761_s12 = scalar_lea.vmem %s220_s24, 512 }
  0x40   : > { %p755_p9 = scmp.ne.s32.totalorder %s220_s24, %s754_s10  ;;  %p762_p1 = scmp.lt.s32.totalorder %s220_s24, %s220_s24 }
  0x41   : > { %p763_p5 = scmp.lt.s32.totalorder %s761_s12, %s754_s10 }
  0x42   : > { %p757_p10 = pnand %p755_p9, %p1062_p4 }
  0x43   : > { %p764_p7 = por %p763_p5, %p762_p1 }
  0x44   : > { %p758_p11 = pneg %p757_p10 }
  0x46   : > { %p765_p0 = pnand %p764_p7, %p758_p11 }
  0x48   : > { %768 = shalt.err (!%p765_p0)
}
  0x49   : > { %622 = dma.hbm_to_vmem [thread:$0]  (!%p1046_p2), %s1227_s0, 256, %s220_s24, [#allocation3], %s935_s8, %s935_s8, %s936_s9  }
  0x4a   : > { %s938_s30 = smov [#allocation7]   ;;  %s769_s29 = scalar_lea.hbm %s1229_s2, 256 }
  0x4b   : > { %s267_s13 = sshll.u32 %s938_s30, 4  ;;  %p770_p0 = scmp.ne.s32.totalorder %s1229_s2, %s769_s29  ;;  %s268_s13 = int_to_ptr.vmem [resolvable:$true] %s267_s13 }
  0x4c   : > { %p776_p13 = scmp.lt.s32.totalorder %s769_s29, %s769_s29 }
  0x4d   : > { %p772_p6 = pnand %p770_p0, %p1062_p4 }
  0x4f   : > { %p773_p12 = pneg %p772_p6 }
  0x51   : > { %p778_p3 = pnand %p776_p13, %p773_p12 }
  0x53   : > { %781 = shalt.err (!%p778_p3)
}
  0x54   : > { %s782_s21 = scalar_lea.vmem %s268_s13, 256  ;;  %s789_s24 = scalar_lea.vmem %s268_s13, 512 }
  0x55   : > { %p783_p8 = scmp.ne.s32.totalorder %s268_s13, %s782_s21  ;;  %p790_p11 = scmp.lt.s32.totalorder %s268_s13, %s268_s13 }
  0x56   : > { %p791_p1 = scmp.lt.s32.totalorder %s789_s24, %s782_s21 }
  0x57   : > { %p785_p9 = pnand %p783_p8, %p1062_p4 }
  0x58   : > { %p792_p5 = por %p791_p1, %p790_p11 }
  0x59   : > { %p786_p10 = pneg %p785_p9 }
  0x5b   : > { %p793_p7 = pnand %p792_p5, %p786_p10 }
  0x5d   : > { %796 = shalt.err (!%p793_p7)
}
  0x5e   : > { %628 = dma.hbm_to_vmem [thread:$0]  (!%p1046_p2), %s1229_s2, 256, %s268_s13, %s1052_s11, %s935_s8, %s935_s8, %s936_s9  }
  0x5f   : > { %p1247_p0 = scmp.ne.s32.totalorder %s1246_s14, 0 }
  0x60   : > { %s281_s26 = sand.u32 (!%p1247_p0), 1, %s920_s19   ;;  %p1248_p4 = scmp.ne.s32.totalorder (!%p1247_p0), %s1239_s27, 0 }
  0x61   : > { %279 = sbr.rel (%p1247_p0) target bundleno = 156 (0x9c), region = 32  ;;  %s594_s18 = sshll.u32 (!%p1247_p0), %s281_s26, 4 }
  0x62   : > { %s282_s28 = scalar_lea.sflag (!%p1247_p0), [#allocation3], %s281_s26  ;;  %s285_s29 = scalar_lea.vmem (!%p1247_p0), [#allocation2], %s594_s18 }
  0x66   : > { %886 = dma.done.wait (%p1248_p4), %s282_s28, 256  }
  0x67   : > { %888 = vsyncadd (%p1248_p4), %s282_s28, 4294967040  ;;  %s290_s7 = sand.u32 1, %s1005_s23   ;;  %s294_s12 = scalar_lea.vmem [#allocation5], %s594_s18 }
  0x68   : > { %s291_s10 = scalar_lea.sflag [#allocation6], %s290_s7 }
  0x69   : > { %890 = dma.done.wait (%p1248_p4), %s291_s10, 512  }
  0x6a   : > { %892 = vsyncadd (%p1248_p4), %s291_s10, 4294966784  ;;  %s1136_s11 = sand.u32 1, %s908_s16   ;;  %v363_v0 = vlaneseq  ;;  %s599_s8 = sshll.u32 %s924_s20, 4  ;;  %v371_v6 = vld [vmem:[%s285_s29] sm:$0xff]  ;;  %v372_v7 = vld [vmem:[%s285_s29 + $0x8] sm:$0xff] }
  0x6b   : > { %v366_v2 = vstv %s599_s8  ;;  %s597_s9 = sshll.u32 %s1136_s11, 3  ;;  %v373_v8 = vld [vmem:[%s294_s12] sm:$0xff]  ;;  %v374_v9 = vld [vmem:[%s294_s12 + $0x8] sm:$0xff]  ;;  %s303_s23 = scalar_lea.vmem [#allocation7], %s594_s18 }
  0x6c   : > { %v364_v1 = vshrl.u32 %v363_v0, 7  ;;  %v375_v10 = vld [vmem:[%s303_s23] sm:$0xff]  ;;  %v376_v11 = vld [vmem:[%s303_s23 + $0x8] sm:$0xff]  ;;  %v377_v12 = vsub.f32 %v371_v6, %v373_v8  ;;  %v378_v13 = vsub.f32 %v372_v7, %v374_v9  ;;  %s602_s27 = sshll.u32 %s924_s20, 7  ;;  %s342_s14 = scalar_lea.vmem [#allocation9], %s597_s9 }
  0x6d   : > { %s427_s13 = sshll.u32 %s342_s14, 4  ;;  %s1148_s25 = scalar_lea.hbm %s1231_s4, %s602_s27  ;;  %s1150_s13 = int_to_ptr.vmem [resolvable:$true] %s427_s13 }
  0x6e   : > { %v365_v3 = vadd.s32 8, %v364_v1  ;;  %v367_v4 = vadd.s32 %v366_v2, %v364_v1  ;;  %v379_v16 = vmul.f32 %v377_v12, %v377_v12  ;;  %v380_v18 = vmul.f32 %v378_v13, %v378_v13  ;;  %s1153_s30 = scalar_lea.vmem [#allocation8], %s597_s9  ;;  %s401_s18 = scalar_lea.sflag [#allocation10], %s1136_s11 }
  0x6f   : > { %s414_s26 = sshll.u32 %s1153_s30, 4  ;;  %s797_s28 = scalar_lea.vmem %s1150_s13, 128  ;;  %s415_s26 = int_to_ptr.vmem [resolvable:$true] %s414_s26 }
  0x70   : > { %v368_v5 = vadd.s32 %v366_v2, %v365_v3  ;;  %vm369_vm0 = vcmp.lt.s32.totalorder %v367_v4, 16  ;;  %v381_v19 = vmul.f32 %v379_v16, %v375_v10  ;;  %v382_v20 = vmul.f32 %v380_v18, %v376_v11  ;;  %p798_p2 = scmp.ne.s32.totalorder %s1150_s13, %s797_s28  ;;  %p1249_p6 = scmp.ne.s32.totalorder %s1241_s5, 0 }
  0x71   : > { %v385_v14 = vsel %vm369_vm0, %v375_v10, 0.0  ;;  %s939_s29 = smov [#allocation9]  }
  0x72   : > { %vm370_vm1 = vcmp.lt.s32.totalorder %v368_v5, 16  ;;  %v383_v21 = vsel %vm369_vm0, %v381_v19, 0.0  ;;  %p799_p12 = pnand %p798_p2, %p1249_p6  ;;  %s801_s7 = sshll.u32 %s939_s29, 4  ;;  %s802_s7 = int_to_ptr.vmem [resolvable:$false] %s801_s7 }
  0x73   : > { %v386_v15 = vsel %vm370_vm1, %v376_v11, 0.0  ;;  %v384_v22 = vsel %vm370_vm1, %v382_v20, 0.0  ;;  %s803_s10 = scalar_lea.vmem %s802_s7, 256  ;;  %p804_p3 = scmp.lt.s32.totalorder %s1150_s13, %s802_s7 }
  0x74   : > { %v392_v17 = vadd.f32 %v386_v15, %v385_v14  ;;  %p800_p13 = pneg %p799_p12  ;;  %p805_p8 = scmp.lt.s32.totalorder %s803_s10, %s797_s28 }
  0x76   : > { %394 = vst [vmem:[%s342_s14] sm:$0xff] %v392_v17  ;;  %p806_p9 = por %p805_p8, %p804_p3 }
  0x78   : > { %p807_p10 = pnand %p806_p9, %p800_p13 }
  0x7a   : > { %810 = shalt.err (!%p807_p10)
}
  0x7b   : > { %s811_s12 = scalar_lea.hbm %s1148_s25, 128  ;;  %s815_s23 = scalar_lea.hbm %s1231_s4, 256 }
  0x7c   : > { %p812_p11 = scmp.ne.s32.totalorder %s1148_s25, %s811_s12  ;;  %p816_p7 = scmp.lt.s32.totalorder %s1148_s25, %s1231_s4 }
  0x7d   : > { %p817_p0 = scmp.lt.s32.totalorder %s815_s23, %s811_s12 }
  0x7e   : > { %p813_p1 = pnand %p812_p11, %p1249_p6 }
  0x7f   : > { %p818_p4 = por %p817_p0, %p816_p7 }
  0x80   : > { %p814_p5 = pneg %p813_p1 }
  0x82   : > { %p819_p2 = pnand %p818_p4, %p814_p5 }
  0x84   : > { %822 = shalt.err (!%p819_p2)
}
  0x85   : > { %616 = dma.vmem_to_hbm [thread:$0]  (%p1249_p6), %s1150_s13, 128, %s1148_s25, %s401_s18   ;;  %v388_v23 = vadd.f32 %v384_v22, %v383_v21 }
  0x86   : > { %s412_s29 = scalar_lea.hbm %s1230_s3, %s602_s27  ;;  %s396_s7 = scalar_lea.sflag [#allocation4], %s1136_s11 }
  0x87   : > { %390 = vst [vmem:[%s1153_s30] sm:$0xff] %v388_v23  ;;  %s823_s10 = scalar_lea.vmem %s415_s26, 128  ;;  %s940_s12 = smov [#allocation8]  }
  0x88   : > { %p824_p12 = scmp.ne.s32.totalorder %s415_s26, %s823_s10  ;;  %s827_s8 = sshll.u32 %s940_s12, 4  ;;  %s828_s8 = int_to_ptr.vmem [resolvable:$false] %s827_s8 }
  0x89   : > { %s829_s9 = scalar_lea.vmem %s828_s8, 256  ;;  %p830_p8 = scmp.lt.s32.totalorder %s415_s26, %s828_s8 }
  0x8a   : > { %p825_p13 = pnand %p824_p12, %p1249_p6  ;;  %p831_p9 = scmp.lt.s32.totalorder %s829_s9, %s823_s10 }
  0x8c   : > { %p826_p3 = pneg %p825_p13  ;;  %p832_p10 = por %p831_p9, %p830_p8 }
  0x8e   : > { %p833_p11 = pnand %p832_p10, %p826_p3 }
  0x90   : > { %836 = shalt.err (!%p833_p11)
}
  0x91   : > { %s837_s20 = scalar_lea.hbm %s412_s29, 128  ;;  %s841_s13 = scalar_lea.hbm %s1230_s3, 256 }
  0x92   : > { %p838_p1 = scmp.ne.s32.totalorder %s412_s29, %s837_s20  ;;  %p842_p0 = scmp.lt.s32.totalorder %s412_s29, %s1230_s3 }
  0x93   : > { %p843_p4 = scmp.lt.s32.totalorder %s841_s13, %s837_s20 }
  0x94   : > { %p839_p5 = pnand %p838_p1, %p1249_p6 }
  0x95   : > { %p844_p2 = por %p843_p4, %p842_p0 }
  0x96   : > { %p840_p7 = pneg %p839_p5 }
  0x98   : > { %p845_p12 = pnand %p844_p2, %p840_p7 }
  0x9a   : > { %848 = shalt.err (!%p845_p12)
}
  0x9b   : > { %615 = dma.vmem_to_hbm [thread:$0]  (%p1249_p6), %s415_s26, 128, %s412_s29, %s396_s7  }
  0x9c PF: > { %s439_s18 = sand.u32 1, %s904_s15   ;;  %p1250_p13 = scmp.ne.s32.totalorder %s1242_s6, 0 }
  0x9d   : > { %p1251_p3 = scmp.ge.s32.totalorder %s932_s22, 2  ;;  %s440_s23 = scalar_lea.sflag [#allocation4], %s439_s18 }
  0x9f   : > { %p630_p8 = pnand %p1251_p3, %p1250_p13 }
  0xa1   : > { %p631_p9 = pneg %p630_p8 }
  0xa3   : > { %894 = dma.done.wait (%p631_p9), %s440_s23, 128  }
  0xa4   : > { %896 = vsyncadd (%p631_p9), %s440_s23, 4294967168  ;;  %s449_s14 = scalar_lea.sflag [#allocation10], %s439_s18 }
  0xa5   : > { %898 = dma.done.wait (%p631_p9), %s449_s14, 128  }
  0xa6   : > { %900 = vsyncadd (%p631_p9), %s449_s14, 4294967168  ;;  %s27_s22 = sadd.s32 1, %s932_s22   ;;  %s1252_s5 = sld [smem:[#allocation17_spill]] }
  0xa7   : > { %p24_p10 = scmp.ge.s32.totalorder %s27_s22, 4   ;;  %s1253_s20 = sld [smem:[#allocation15_spill]] }
  0xa8   : > { %s1254_s21 = sld [smem:[#allocation16_spill]]  ;;  %s1255_s15 = smov %s908_s16 }
  0xa9   : > { %s1256_s16 = smov %s912_s17  ;;  %s1258_s18 = smov %s920_s19 }
  0xaa   : > { %s1217_s19 = smov 0   ;;  %26 = sbr.rel (!%p24_p10) target bundleno = 11 (0xb), region = 122 }
  0xac   : > { %s1257_s17 = smov %s1252_s5 }
  0xaf   :  { %454 = vsyncpa [#allocation3], 1 }
  0xb0   :  { %456 = vsyncpa [#allocation3 + $0x1], 1 }
  0xb1   :  { %457 = vsyncpa [#allocation6], 1 }
  0xb2   :  { %459 = vsyncpa [#allocation6 + $0x1], 1 }
  0xb3   :  { %460 = vsyncpa [#allocation4], 1 }
  0xb4   :  { %462 = vsyncpa [#allocation4 + $0x1], 1 }
  0xb5   :  { %463 = vsyncpa [#allocation10], 1 }
  0xb6   :  { %465 = vsyncpa [#allocation10 + $0x1], 1 }

</bundles_post_ra>
